<compile_context>
chip_gen: v6e
topology: v6e:2x2x1
jax: 0.10.0
libtpu: 0.0.40
codegen_flags: <defaults>
</compile_context>

<pallas_src>
import numpy as np
import jax
import jax.numpy as jnp
from jax import lax
from jax.experimental import pallas as pl
from jax.experimental.pallas import tpu as pltpu

NN_LAYERS = [8, 16, 32, 13]   # default poseNetv2_mt config
D_IN = 15                     # [x0,y0,x1,y1,score,lex,ley,rex,rey,nx,ny,lmx,lmy,rmx,rmy]
MAX_TB = 4096                 # lane-axis batch tile (v7x-safe)
XLA_FALLBACK_BATCH = 512      # below this, fused XLA beats the pallas_call launch

# (10, 8) fold of format()'s "take [le, re, lm, rm] and subtract the nose" step:
#   feat = norm_landmarks @ _P, norm_landmarks = [lex,ley,rex,rey,nx,ny,lmx,lmy,rmx,rmy]
_P_np = np.zeros((10, 8), dtype=np.float32)
for _j, _i in enumerate([0, 1, 2, 3, 6, 7, 8, 9]):
    _P_np[_i, _j] = 1.0
    _P_np[4 + (_j % 2), _j] = -1.0     # minus nose-x for even feat cols, nose-y for odd
_P = jnp.asarray(_P_np)


def _leaky(v):
    # nn.LeakyReLU default negative_slope = 0.01
    return jnp.where(v > 0, v, 0.01 * v)


def posenet_kernel(xT_ref, w1T_ref, w2T_ref, b2T_ref, w3T_ref, b3T_ref, o_ref):
    # xT_ref block: (15, TB) — features on sublanes, batch on lanes.
    xT = xT_ref[...].astype(jnp.float32)

    # ---- format(): bbox-relative landmark normalization (full-lane-width VPU) ----
    bx0 = xT_ref[0:1, :].astype(jnp.float32)        # sublane ref-views, (1, TB)
    by0 = xT_ref[1:2, :].astype(jnp.float32)
    bx1 = xT_ref[2:3, :].astype(jnp.float32)
    by1 = xT_ref[3:4, :].astype(jnp.float32)
    inv_w = pl.reciprocal(bx1 - bx0 + 0.001, approx=False)
    inv_h = pl.reciprocal(by1 - by0 + 0.001, approx=False)
    cx = (bx1 + bx0) * 0.5
    cy = (by1 + by0) * 0.5

    # Per-row select: rows 5,7,9,11,13 are landmark x-coords, 6,8,...,14 are y-coords.
    # Row 4 (score, unused by the model) is overwritten with 1.0 and consumes the
    # folded layer-1 bias column; rows 0-3 (bbox) hit zero weight columns.
    row = lax.broadcasted_iota(jnp.int32, xT.shape, 0)
    is_x = (row % 2) == 1
    center = jnp.where(is_x, cx, cy)                # (1,TB) lane-invariant -> (15,TB)
    inv_scale = jnp.where(is_x, inv_w, inv_h)
    norm_aug = jnp.where(row == 4, 1.0, (xT - center) * inv_scale)       # (15, TB)

    # ---- MLP (weights transposed; batch = wide MXU N dim) ----
    # Linear(8,16)+LeakyReLU -> Linear(16,32)+LeakyReLU -> Dropout(identity) ->
    # Linear(32,13)+LeakyReLU.  Permutation + nose-sub + b1 are folded into w1T.
    h1 = _leaky(jnp.dot(w1T_ref[...], norm_aug, preferred_element_type=jnp.float32))
    h2 = _leaky(jnp.dot(w2T_ref[...], h1, preferred_element_type=jnp.float32)
                + b2T_ref[...])
    # TODO(synk): nn.Dropout(p=0.9) is identity in eval mode; training-mode stochastic
    # masking is not implemented here.
    y = _leaky(jnp.dot(w3T_ref[...], h2, preferred_element_type=jnp.float32)
               + b3T_ref[...])
    o_ref[...] = y.astype(o_ref.dtype)


def _round_up(n, m):
    return ((n + m - 1) // m) * m


def _choose_tb(B):
    if B <= 256:
        return B                       # single full-lane block (lane dim == array dim)
    # Guarantee >= 2 grid steps for large batches (v7x megacore); lane tile % 128 == 0.
    return min(MAX_TB, _round_up((B + 1) // 2, 128))


@jax.jit
def _pallas_forward(x, w1, b1, w2, b2, w3, b3):
    B = x.shape[0]
    fout = w3.shape[1]
    TB = _choose_tb(B)
    grid = (pl.cdiv(B, TB),)

    # Host-side weight folding (~1.1 K parameters, negligible):
    #   w1T_aug[:, 0:4]  = 0          (bbox rows contribute nothing)
    #   w1T_aug[:, 4]    = b1         (consumed by the "ones" score row)
    #   w1T_aug[:, 5:15] = (P @ w1)^T (format() permutation + nose subtraction)
    w1_eff_T = jnp.dot(_P.astype(w1.dtype), w1).T                       # (16, 10)
    w1T_aug = jnp.concatenate(
        [jnp.zeros((w1.shape[1], 4), w1.dtype), b1.reshape(-1, 1), w1_eff_T],
        axis=1)                                                         # (16, 15)
    w2T, b2T = w2.T, b2.reshape(-1, 1)                                  # (32,16), (32,1)
    w3T, b3T = w3.T, b3.reshape(-1, 1)                                  # (13,32), (13,1)

    xT = x.T                                                            # (15, B)

    resident = lambda a: pl.BlockSpec(a.shape, lambda i: (0,) * a.ndim)
    weight_bytes = sum(int(a.size) * a.dtype.itemsize
                       for a in (w1T_aug, w2T, b2T, w3T, b3T))

    yT = pl.pallas_call(
        posenet_kernel,
        out_shape=jax.ShapeDtypeStruct((fout, B), x.dtype),
        grid_spec=pltpu.PrefetchScalarGridSpec(
            num_scalar_prefetch=0,
            grid=grid,
            in_specs=[
                pl.BlockSpec((D_IN, TB), lambda i: (0, i)),   # pipelined activations
                resident(w1T_aug), resident(w2T), resident(b2T),
                resident(w3T), resident(b3T),
            ],
            out_specs=pl.BlockSpec((fout, TB), lambda i: (0, i)),
        ),
        compiler_params=pltpu.CompilerParams(
            dimension_semantics=("parallel",),
            vmem_limit_bytes=32 << 20),
        cost_estimate=pl.CostEstimate(
            flops=2 * B * (15 * 16 + 16 * 32 + 32 * 13) + 64 * B,
            transcendentals=2 * B,
            bytes_accessed=B * (D_IN + fout) * x.dtype.itemsize + weight_bytes,
        ),
    )(xT, w1T_aug, w2T, b2T, w3T, b3T)
    return yT.T                                   # back to PyTorch [B, fout] layout


def reference_forward(x, w1, b1, w2, b2, w3, b3):
    """Pure-JAX reference mirroring the PyTorch forward (eval mode), exact divides."""
    bx0, by0, bx1, by1 = x[:, 0:1], x[:, 1:2], x[:, 2:3], x[:, 3:4]
    width = bx1 - bx0 + 0.001
    height = by1 - by0 + 0.001
    cx = (bx1 + bx0) / 2
    cy = (by1 + by0) / 2
    lm = x[:, 5:]
    ex = (lm[:, 0::2] - cx) / width
    ey = (lm[:, 1::2] - cy) / height
    nx = ex[:, 2:3]
    ny = ey[:, 2:3]
    ex = ex - nx
    ey = ey - ny
    feat = jnp.stack([ex[:, 0], ey[:, 0], ex[:, 1], ey[:, 1],
                      ex[:, 3], ey[:, 3], ex[:, 4], ey[:, 4]], axis=1)
    h1 = _leaky(feat @ w1 + b1)
    h2 = _leaky(h1 @ w2 + b2)
    return _leaky(h2 @ w3 + b3)


_xla_forward = jax.jit(reference_forward)


def posenet_forward(x, w1, b1, w2, b2, w3, b3, *, force_pallas=False):
    """[B, 15] -> [B, 13] eval-mode forward, auto-dispatching small batches to XLA."""
    if not force_pallas and x.shape[0] < XLA_FALLBACK_BATCH:
        return _xla_forward(x, w1, b1, w2, b2, w3, b3)
    return _pallas_forward(x, w1, b1, w2, b2, w3, b3)


def init_params(key, nn_layers=NN_LAYERS):
    """Deterministic synthetic init. Weights stored as (in, out); biases as (1, out)."""
    params = []
    for i in range(len(nn_layers) - 1):
        key, kw, kb = jax.random.split(key, 3)
        fan_in, fan_out = nn_layers[i], nn_layers[i + 1]
        bound = 1.0 / jnp.sqrt(fan_in)
        w = jax.random.uniform(kw, (fan_in, fan_out), jnp.float32, -bound, bound)
        b = jax.random.uniform(kb, (1, fan_out), jnp.float32, -bound, bound)
        params += [w, b]
    return params


def _make_input(key, B):
    x = jax.random.uniform(key, (B, D_IN), jnp.float32, 0.0, 1.0)
    # make bboxes well-formed: x1 > x0, y1 > y0
    return x.at[:, 2].set(x[:, 0] + 0.5).at[:, 3].set(x[:, 1] + 0.5)


if __name__ == "__main__":
    key = jax.random.PRNGKey(0)
    key, k_small, k_big = jax.random.split(key, 3)
    w1, b1, w2, b2, w3, b3 = init_params(key)
    params = (w1, b1, w2, b2, w3, b3)

    # Divides are exact now; remaining delta vs. reference is MXU default-precision f32.
    tol = dict(atol=1e-2, rtol=1e-2)

    # Small batch forced through the Pallas path (single full-lane block, TB = B = 2).
    x_small = _make_input(k_small, 2)
    y_small = jax.block_until_ready(posenet_forward(x_small, *params, force_pallas=True))
    assert y_small.shape == (2, NN_LAYERS[-1])
    assert jnp.allclose(y_small, reference_forward(x_small, *params), **tol)

    # Larger ragged batch: TB = 512, grid of 2 (second lane-block partial and masked).
    x_big = _make_input(k_big, 1000)
    y_big = jax.block_until_ready(posenet_forward(x_big, *params, force_pallas=True))
    assert y_big.shape == (1000, NN_LAYERS[-1])
    assert jnp.allclose(y_big, reference_forward(x_big, *params), **tol)

    # Auto-dispatch: tiny batches take the fused-XLA fallback (no kernel launch).
    y_fb = jax.block_until_ready(posenet_forward(x_small, *params))
    assert y_fb.shape == (2, NN_LAYERS[-1])
    assert jnp.allclose(y_fb, reference_forward(x_small, *params), atol=1e-5, rtol=1e-5)

    print("KERNEL_OK")
</pallas_src>

<mosaic_0001>
module attributes {stable_mosaic.version = 11 : i64} {
  func.func @posenet_kernel(%arg0: i32, %arg1: memref<15x2xf32, #tpu.memory_space<vmem>>, %arg2: memref<16x15xf32, #tpu.memory_space<vmem>>, %arg3: memref<32x16xf32, #tpu.memory_space<vmem>>, %arg4: memref<32x1xf32, #tpu.memory_space<vmem>>, %arg5: memref<13x32xf32, #tpu.memory_space<vmem>>, %arg6: memref<13x1xf32, #tpu.memory_space<vmem>>, %arg7: memref<13x2xf32, #tpu.memory_space<vmem>>) attributes {dimension_semantics = [#tpu.dimension_semantics<parallel>], iteration_bounds = array<i64: 1>, scalar_prefetch = 0 : i64, scratch_operands = 0 : i64, tpu.core_type = #tpu.core_type<tc>, window_params = [{transform_indices = @transform_0, window_bounds = array<i64: 15, 2>}, {pipeline_mode = #tpu.pipeline_mode<synchronous>, transform_indices = @transform_1, window_bounds = array<i64: 16, 15>}, {pipeline_mode = #tpu.pipeline_mode<synchronous>, transform_indices = @transform_2, window_bounds = array<i64: 32, 16>}, {pipeline_mode = #tpu.pipeline_mode<synchronous>, transform_indices = @transform_3, window_bounds = array<i64: 32, 1>}, {pipeline_mode = #tpu.pipeline_mode<synchronous>, transform_indices = @transform_4, window_bounds = array<i64: 13, 32>}, {pipeline_mode = #tpu.pipeline_mode<synchronous>, transform_indices = @transform_5, window_bounds = array<i64: 13, 1>}, {transform_indices = @transform_6, window_bounds = array<i64: 13, 2>}]} {
    %c0 = arith.constant 0 : index
    %c0_0 = arith.constant 0 : index
    %0 = vector.load %arg1[%c0, %c0_0] : memref<15x2xf32, #tpu.memory_space<vmem>>, vector<15x2xf32>
    %c0_1 = arith.constant 0 : index
    %c0_2 = arith.constant 0 : index
    %1 = vector.load %arg1[%c0_1, %c0_2] : memref<15x2xf32, #tpu.memory_space<vmem>>, vector<1x2xf32>
    %c1 = arith.constant 1 : index
    %c0_3 = arith.constant 0 : index
    %2 = vector.load %arg1[%c1, %c0_3] : memref<15x2xf32, #tpu.memory_space<vmem>>, vector<1x2xf32>
    %c2 = arith.constant 2 : index
    %c0_4 = arith.constant 0 : index
    %3 = vector.load %arg1[%c2, %c0_4] : memref<15x2xf32, #tpu.memory_space<vmem>>, vector<1x2xf32>
    %c3 = arith.constant 3 : index
    %c0_5 = arith.constant 0 : index
    %4 = vector.load %arg1[%c3, %c0_5] : memref<15x2xf32, #tpu.memory_space<vmem>>, vector<1x2xf32>
    %5 = arith.subf %3, %1 : vector<1x2xf32>
    %cst = arith.constant 1.000000e-03 : f32
    %6 = vector.broadcast %cst : f32 to vector<1x2xf32>
    %7 = arith.addf %5, %6 : vector<1x2xf32>
    %8 = tpu.reciprocal %7 : vector<1x2xf32> -> vector<1x2xf32>
    %9 = arith.subf %4, %2 : vector<1x2xf32>
    %cst_6 = arith.constant 1.000000e-03 : f32
    %10 = vector.broadcast %cst_6 : f32 to vector<1x2xf32>
    %11 = arith.addf %9, %10 : vector<1x2xf32>
    %12 = tpu.reciprocal %11 : vector<1x2xf32> -> vector<1x2xf32>
    %13 = arith.addf %3, %1 : vector<1x2xf32>
    %cst_7 = arith.constant 5.000000e-01 : f32
    %14 = vector.broadcast %cst_7 : f32 to vector<1x2xf32>
    %15 = arith.mulf %13, %14 : vector<1x2xf32>
    %16 = arith.addf %4, %2 : vector<1x2xf32>
    %cst_8 = arith.constant 5.000000e-01 : f32
    %17 = vector.broadcast %cst_8 : f32 to vector<1x2xf32>
    %18 = arith.mulf %16, %17 : vector<1x2xf32>
    %19 = tpu.iota {dimensions = array<i32: 0>} : vector<15x2xi32>
    %c2_i32 = arith.constant 2 : i32
    %c0_i32 = arith.constant 0 : i32
    %20 = arith.cmpi eq, %c2_i32, %c0_i32 : i32
    %c1_i32 = arith.constant 1 : i32
    %21 = arith.select %20, %c1_i32, %c2_i32 : i32
    %22 = vector.broadcast %21 : i32 to vector<15x2xi32>
    %23 = arith.remsi %19, %22 : vector<15x2xi32>
    %c0_i32_9 = arith.constant 0 : i32
    %24 = vector.broadcast %c0_i32_9 : i32 to vector<15x2xi32>
    %25 = arith.cmpi ne, %23, %24 : vector<15x2xi32>
    %c0_i32_10 = arith.constant 0 : i32
    %26 = vector.broadcast %c0_i32_10 : i32 to vector<15x2xi32>
    %27 = arith.cmpi slt, %23, %26 : vector<15x2xi32>
    %c0_i32_11 = arith.constant 0 : i32
    %28 = arith.cmpi slt, %21, %c0_i32_11 : i32
    %29 = vector.broadcast %28 : i1 to vector<15x2xi1>
    %30 = vector.broadcast %29 : vector<15x2xi1> to vector<15x2xi1>
    %31 = arith.xori %27, %30 : vector<15x2xi1>
    %32 = arith.andi %31, %25 : vector<15x2xi1>
    %33 = vector.broadcast %21 : i32 to vector<15x2xi32>
    %34 = arith.addi %23, %33 : vector<15x2xi32>
    %35 = arith.select %32, %34, %23 : vector<15x2xi1>, vector<15x2xi32>
    %c1_i32_12 = arith.constant 1 : i32
    %36 = vector.broadcast %c1_i32_12 : i32 to vector<15x2xi32>
    %37 = arith.cmpi eq, %35, %36 : vector<15x2xi32>
    %38 = vector.shape_cast %15 : vector<1x2xf32> to vector<1x2xf32>
    %39 = vector.broadcast %38 : vector<1x2xf32> to vector<15x2xf32>
    %40 = vector.shape_cast %18 : vector<1x2xf32> to vector<1x2xf32>
    %41 = vector.broadcast %40 : vector<1x2xf32> to vector<15x2xf32>
    %42 = arith.select %37, %39, %41 : vector<15x2xi1>, vector<15x2xf32>
    %43 = vector.shape_cast %8 : vector<1x2xf32> to vector<1x2xf32>
    %44 = vector.broadcast %43 : vector<1x2xf32> to vector<15x2xf32>
    %45 = vector.shape_cast %12 : vector<1x2xf32> to vector<1x2xf32>
    %46 = vector.broadcast %45 : vector<1x2xf32> to vector<15x2xf32>
    %47 = arith.select %37, %44, %46 : vector<15x2xi1>, vector<15x2xf32>
    %c4_i32 = arith.constant 4 : i32
    %48 = vector.broadcast %c4_i32 : i32 to vector<15x2xi32>
    %49 = arith.cmpi eq, %19, %48 : vector<15x2xi32>
    %50 = arith.subf %0, %42 : vector<15x2xf32>
    %51 = arith.mulf %50, %47 : vector<15x2xf32>
    %cst_13 = arith.constant 1.000000e+00 : f32
    %52 = vector.broadcast %cst_13 : f32 to vector<15x2xf32>
    %53 = arith.select %49, %52, %51 : vector<15x2xi1>, vector<15x2xf32>
    %c0_14 = arith.constant 0 : index
    %c0_15 = arith.constant 0 : index
    %54 = vector.load %arg2[%c0_14, %c0_15] : memref<16x15xf32, #tpu.memory_space<vmem>>, vector<16x15xf32>
    %cst_16 = arith.constant dense<0.000000e+00> : vector<16x2xf32>
    %55 = tpu.matmul %54, %53, %cst_16 {dimension_numbers = #tpu.dot_dimension_numbers<[1], [0], [0], [1], [0, 0, 1, 1], [], []>} : vector<16x15xf32>, vector<15x2xf32>, vector<16x2xf32> -> vector<16x2xf32>
    %cst_17 = arith.constant 0.000000e+00 : f32
    %56 = vector.broadcast %cst_17 : f32 to vector<16x2xf32>
    %57 = arith.cmpf ogt, %55, %56 : vector<16x2xf32>
    %cst_18 = arith.constant 0.00999999977 : f32
    %58 = vector.broadcast %cst_18 : f32 to vector<16x2xf32>
    %59 = arith.mulf %58, %55 : vector<16x2xf32>
    %60 = arith.select %57, %55, %59 : vector<16x2xi1>, vector<16x2xf32>
    %c0_19 = arith.constant 0 : index
    %c0_20 = arith.constant 0 : index
    %61 = vector.load %arg3[%c0_19, %c0_20] : memref<32x16xf32, #tpu.memory_space<vmem>>, vector<32x16xf32>
    %cst_21 = arith.constant dense<0.000000e+00> : vector<32x2xf32>
    %62 = tpu.matmul %61, %60, %cst_21 {dimension_numbers = #tpu.dot_dimension_numbers<[1], [0], [0], [1], [0, 0, 1, 1], [], []>} : vector<32x16xf32>, vector<16x2xf32>, vector<32x2xf32> -> vector<32x2xf32>
    %c0_22 = arith.constant 0 : index
    %c0_23 = arith.constant 0 : index
    %63 = vector.load %arg4[%c0_22, %c0_23] : memref<32x1xf32, #tpu.memory_space<vmem>>, vector<32x1xf32>
    %64 = vector.broadcast %63 : vector<32x1xf32> to vector<32x2xf32>
    %65 = arith.addf %62, %64 : vector<32x2xf32>
    %cst_24 = arith.constant 0.000000e+00 : f32
    %66 = vector.broadcast %cst_24 : f32 to vector<32x2xf32>
    %67 = arith.cmpf ogt, %65, %66 : vector<32x2xf32>
    %cst_25 = arith.constant 0.00999999977 : f32
    %68 = vector.broadcast %cst_25 : f32 to vector<32x2xf32>
    %69 = arith.mulf %68, %65 : vector<32x2xf32>
    %70 = arith.select %67, %65, %69 : vector<32x2xi1>, vector<32x2xf32>
    %c0_26 = arith.constant 0 : index
    %c0_27 = arith.constant 0 : index
    %71 = vector.load %arg5[%c0_26, %c0_27] : memref<13x32xf32, #tpu.memory_space<vmem>>, vector<13x32xf32>
    %cst_28 = arith.constant dense<0.000000e+00> : vector<13x2xf32>
    %72 = tpu.matmul %71, %70, %cst_28 {dimension_numbers = #tpu.dot_dimension_numbers<[1], [0], [0], [1], [0, 0, 1, 1], [], []>} : vector<13x32xf32>, vector<32x2xf32>, vector<13x2xf32> -> vector<13x2xf32>
    %c0_29 = arith.constant 0 : index
    %c0_30 = arith.constant 0 : index
    %73 = vector.load %arg6[%c0_29, %c0_30] : memref<13x1xf32, #tpu.memory_space<vmem>>, vector<13x1xf32>
    %74 = vector.broadcast %73 : vector<13x1xf32> to vector<13x2xf32>
    %75 = arith.addf %72, %74 : vector<13x2xf32>
    %cst_31 = arith.constant 0.000000e+00 : f32
    %76 = vector.broadcast %cst_31 : f32 to vector<13x2xf32>
    %77 = arith.cmpf ogt, %75, %76 : vector<13x2xf32>
    %cst_32 = arith.constant 0.00999999977 : f32
    %78 = vector.broadcast %cst_32 : f32 to vector<13x2xf32>
    %79 = arith.mulf %78, %75 : vector<13x2xf32>
    %80 = arith.select %77, %75, %79 : vector<13x2xi1>, vector<13x2xf32>
    %c0_33 = arith.constant 0 : index
    %c0_34 = arith.constant 0 : index
    %81 = vector.load %arg7[%c0_33, %c0_34] : memref<13x2xf32, #tpu.memory_space<vmem>>, vector<13x2xf32>
    tpu.vector_store %arg7[%c0_33, %c0_34], %80 {strides = array<i32>} : memref<13x2xf32, #tpu.memory_space<vmem>>, vector<13x2xf32>,
    return
  }
  func.func @transform_0(%arg0: i32) -> (i32, i32) {
    %c0_i32 = arith.constant 0 : i32
    %c0_i32_0 = arith.constant 0 : i32
    return %c0_i32, %arg0 : i32, i32
  }
  func.func @transform_1(%arg0: i32) -> (i32, i32) {
    %c0_i32 = arith.constant 0 : i32
    %c0_i32_0 = arith.constant 0 : i32
    %c0_i32_1 = arith.constant 0 : i32
    return %c0_i32, %c0_i32_0 : i32, i32
  }
  func.func @transform_2(%arg0: i32) -> (i32, i32) {
    %c0_i32 = arith.constant 0 : i32
    %c0_i32_0 = arith.constant 0 : i32
    %c0_i32_1 = arith.constant 0 : i32
    return %c0_i32, %c0_i32_0 : i32, i32
  }
  func.func @transform_3(%arg0: i32) -> (i32, i32) {
    %c0_i32 = arith.constant 0 : i32
    %c0_i32_0 = arith.constant 0 : i32
    %c0_i32_1 = arith.constant 0 : i32
    return %c0_i32, %c0_i32_0 : i32, i32
  }
  func.func @transform_4(%arg0: i32) -> (i32, i32) {
    %c0_i32 = arith.constant 0 : i32
    %c0_i32_0 = arith.constant 0 : i32
    %c0_i32_1 = arith.constant 0 : i32
    return %c0_i32, %c0_i32_0 : i32, i32
  }
  func.func @transform_5(%arg0: i32) -> (i32, i32) {
    %c0_i32 = arith.constant 0 : i32
    %c0_i32_0 = arith.constant 0 : i32
    %c0_i32_1 = arith.constant 0 : i32
    return %c0_i32, %c0_i32_0 : i32, i32
  }
  func.func @transform_6(%arg0: i32) -> (i32, i32) {
    %c0_i32 = arith.constant 0 : i32
    %c0_i32_0 = arith.constant 0 : i32
    return %c0_i32, %arg0 : i32, i32
  }
}

</mosaic_0001>

<bundles_post_ra>
// kernel: _pallas_forward.1
= control target key start
LH: loop header
LB: loop body
LE: loop exit
PB: predicated region body
PF: predicated region fallthrough
CT: control target
= control target key end

     0   :  { %v39_v0 = vlaneseq  ;;  %vm98_vm0 = vcmask 121856   ;;  %vm105_vm3 = vcmask 1046528   ;;  %vm218_vm5 = vcmask 130048   ;;  %s624_s0 = inlined_call_operand.vmem [shape: f32[15,2], index: 0, kind: input, shape index: {}]   ;;  %s625_s1 = inlined_call_operand.vmem [shape: f32[16,15], index: 1, kind: input, shape index: {}]   ;;  %s626_s2 = inlined_call_operand.vmem [shape: f32[32,16], index: 2, kind: input, shape index: {}]   ;;  %s627_s3 = inlined_call_operand.vmem [shape: f32[32,1], index: 3, kind: input, shape index: {}]   ;;  %s628_s5 = inlined_call_operand.vmem [shape: f32[13,1], index: 5, kind: input, shape index: {}]   ;;  %s629_s4 = inlined_call_operand.vmem [shape: f32[13,32], index: 4, kind: input, shape index: {}]   ;;  %s630_s6 = inlined_call_operand.vmem [shape: f32[13,2], index: 6, kind: output, shape index: {}]  }
   0x1   :  { %v25_v1 = vld [vmem:[%s624_s0] sm:$0x1]  ;;  %v26_v2 = vld [vmem:[%s624_s0 + $0x1] sm:$0x1]  ;;  %v27_v3 = vld [vmem:[%s624_s0 + $0x2] sm:$0x1] }
   0x2   :  { %v28_v4 = vld [vmem:[%s624_s0 + $0x3] sm:$0x1]  ;;  %v29_v5 = vsub.f32 %v27_v3, %v25_v1  ;;  %v40_v7 = vshrl.u32 %v39_v0, 7  ;;  %v35_v11 = vadd.f32 %v27_v3, %v25_v1  ;;  %v24_v23 = vld [vmem:[%s624_s0 + $0x8] sm:$0x7f]  ;;  %v498_v40 = vmov 0  }
   0x3   :  { %v32_v6 = vsub.f32 %v28_v4, %v26_v2  ;;  %v96_v8 = vld [vmem:[%s625_s1] sm:$0xff]  ;;  %v37_v12 = vadd.f32 %v28_v4, %v26_v2  ;;  %v97_v38 = vld [vmem:[%s625_s1 + $0x8] sm:$0xff]  ;;  %492 = vset.pattern.permute.xlu0 %v498_v40  ;;  %v197_v41 = vld [vmem:[%s627_s3 + $0x18] sm:$0xff]  ;;  %493 = vset.pattern.permute.xlu1 %v498_v40  ;;  %vm342_vm8 = vcmask 261120   ;;  %vm432_vm14 = vcmask 12288  }
   0x4   :  { %467 = vmatprep.mubr.msk.f32.mxu0 %vm98_vm0, %v96_v8  ;;  %v30_v9 = vadd.f32 0.001, %v29_v5  ;;  %v41_v13 = vadd.s32 8, %v40_v7  ;;  %v36_v14 = vmul.f32 0.5, %v35_v11  ;;  %v70_v16 = vsub.s32 0, %v40_v7  ;;  %v23_v25 = vld [vmem:[%s624_s0] sm:$0xff]  ;;  %215 = vperm.xlu0 %492, %v197_v41  }
   0x5   :  { %v33_v10 = vadd.f32 0.001, %v32_v6  ;;  %v38_v15 = vmul.f32 0.5, %v37_v12  ;;  %v46_v18 = vand.u32 1, %v40_v7  ;;  %vm88_vm4 = vcmp.eq.s32.totalorder %v40_v7, 4  ;;  %v190_v39 = vld [vmem:[%s626_s2] sm:$0xff] }
   0x6   :  { %494 = vrcp.f32 %v30_v9  ;;  %v53_v17 = vand.u32 1, %v41_v13  ;;  %v71_v19 = vrot.slane %v36_v14, %v70_v16  ;;  %474 = vmatprep.mubr.msk.f32.mxu1 %vm218_vm5, %v190_v39  ;;  %v195_v42 = vld [vmem:[%s627_s3 + $0x8] sm:$0xff]  ;;  %v196_v43 = vld [vmem:[%s627_s3 + $0x10] sm:$0xff]  ;;  %v194_v44 = vld [vmem:[%s627_s3] sm:$0xff] }
   0x7   :  { %496 = vrcp.f32 %v33_v10  ;;  %v75_v20 = vrot.slane %v38_v15, %v70_v16  ;;  %vm554_vm2 = vcmp.eq.s32.totalorder %v46_v18, 1  ;;  %205 = vperm.xlu1 %493, %v195_v42   ;;  %v330_v45 = vld [vmem:[%s628_s5] sm:$0xff]  ;;  %v331_v46 = vld [vmem:[%s628_s5 + $0x8] sm:$0x1f]  ;;  %v192_v54 = vld [vmem:[%s626_s2 + $0x10] sm:$0xff] }
   0x8   :  { %vm550_vm1 = vcmp.eq.s32.totalorder %v53_v17, 1  ;;  %210 = vperm.xlu0 %492, %v196_v43   ;;  %v191_v53 = vld [vmem:[%s626_s2 + $0x8] sm:$0xff]  ;;  %v193_v55 = vld [vmem:[%s626_s2 + $0x18] sm:$0xff]  ;;  %v328_v56 = vld [vmem:[%s629_s4] sm:$0xff] }
   0x9   :  { %v77_v24 = vsel %vm550_vm1, %v71_v19, %v75_v20  ;;  %v76_v26 = vsel %vm554_vm2, %v71_v19, %v75_v20  ;;  %v329_v13 = vld [vmem:[%s629_s4 + $0x8] sm:$0x1f] }
   0xa   :  { %v91_v30 = vsub.f32 %v24_v23, %v77_v24  ;;  %v90_v31 = vsub.f32 %v23_v25, %v76_v26 }
   0xb   :  { %200 = vperm.xlu1 %493, %v194_v44  }
   0xc   :  { %334 = vperm.xlu0 %492, %v330_v45  }
   0xf   :  { %339 = vperm.xlu1 %493, %v331_v46  }
  0x13   :  { %v495_v27 = vpop.eup %494 }
  0x14   :  { %v497_v28 = vpop.eup %496  ;;  %v81_v29 = vrot.slane %v495_v27, %v70_v16 }
  0x15   :  { %v85_v32 = vrot.slane %v497_v28, %v70_v16 }
  0x17   :  { %v87_v33 = vsel %vm550_vm1, %v81_v29, %v85_v32  ;;  %v86_v34 = vsel %vm554_vm2, %v81_v29, %v85_v32 }
  0x18   :  { %v93_v35 = vmul.f32 %v91_v30, %v87_v33  ;;  %v92_v36 = vmul.f32 %v90_v31, %v86_v34 }
  0x1a   :  { %463 = vmatprep.subr.msk.mxu0 %vm105_vm3, %v93_v35  ;;  %v94_v37 = vsel %vm88_vm4, 1.0, %v92_v36 }
  0x1b   :  { %464 = vmatpush3.msk.msra.mxu0 %vm105_vm3, %v93_v35 }
  0x1c   :  { %465 = vmatprep.subr.mxu0 %v94_v37 }
  0x1d   :  { %466 = vmatpush3.msra.mxu0 %v94_v37 }
  0x1e   :  { %468 = vmatmul.mubr.msk.f32.vlgmr.msra.gmra.mxu0 %vm98_vm0, %v97_v38  ;;  %vm430_vm0 = vcmask 15360  }
  0x1f   :  { %488 = vmatprep.mubr.msk.f32.mxu0 %vm342_vm8, %v328_v56 }
  0x7f   :  { %v216_v58 = vpop.permute.xlu0 %215 }
  0x82   :  { %v206_v57 = vpop.permute.xlu1 %205 }
  0x83   :  { %v211_v1 = vpop.permute.xlu0 %210 }
  0x86   :  { %v201_v61 = vpop.permute.xlu1 %200 }
  0x87   :  { %v335_v17 = vpop.permute.xlu0 %334 }
  0x8a   :  { %v340_v14 = vpop.permute.xlu1 %339 }
  0xde   :  { %v469_v47 = vpop.f32.mrf.mxu0 }
  0xdf   :  { %v187_v48 = vmul.f32 0.01, %v469_v47  ;;  %vm185_vm6 = vcmp.gt.f32.partialorder %v469_v47, 0.0 }
  0xe0   :  { %v175_v49 = vpop.f32.mrf.mxu0 }
  0xe1   :  { %vm184_vm7 = vcmp.gt.f32.partialorder %v175_v49, 0.0  ;;  %v186_v50 = vmul.f32 0.01, %v175_v49  ;;  %v189_v51 = vsel %vm185_vm6, %v469_v47, %v187_v48 }
  0xe2   :  { %470 = vmatprep.subr.mxu1 %v189_v51 }
  0xe3   :  { %471 = vmatpush3.msra.mxu1 %v189_v51  ;;  %v188_v52 = vsel %vm184_vm7, %v175_v49, %v186_v50 }
  0xe4   :  { %472 = vmatprep.subr.mxu1 %v188_v52 }
  0xe5   :  { %473 = vmatpush3.msra.mxu1 %v188_v52 }
  0xe6   :  { %475 = vmatmul.mubr.msk.f32.vlgmr.msra.gmra.mxu1 %vm218_vm5, %v191_v53 }
  0xe7   :  { %477 = vmatprep.mubr.msk.f32.mxu1 %vm218_vm5, %v192_v54 }
  0xea   :  { %478 = vmatmul.mubr.msk.f32.gmra.mxu1 %vm218_vm5, %v193_v55 }
 0x1a6   :  { %v476_v59 = vpop.f32.mrf.mxu1 }
 0x1a7   :  { %v303_v63 = vadd.f32 %v476_v59, %v206_v57 }
 0x1a8   :  { %v297_v60 = vpop.f32.mrf.mxu1 }
 0x1a9   :  { %v298_v3 = vadd.f32 %v297_v60, %v201_v61  ;;  %v321_v6 = vmul.f32 0.01, %v303_v63  ;;  %vm317_vm11 = vcmp.gt.f32.partialorder %v303_v63, 0.0 }
 0x1aa   :  { %v479_v62 = vpop.f32.mrf.mxu1 }
 0x1ab   :  { %v313_v0 = vadd.f32 %v479_v62, %v216_v58  ;;  %v320_v9 = vmul.f32 0.01, %v298_v3  ;;  %vm316_vm12 = vcmp.gt.f32.partialorder %v298_v3, 0.0  ;;  %v325_v11 = vsel %vm317_vm11, %v303_v63, %v321_v6 }
 0x1ac   :  { %v307_v2 = vpop.f32.mrf.mxu1 }
 0x1ad   :  { %v323_v4 = vmul.f32 0.01, %v313_v0  ;;  %v308_v5 = vadd.f32 %v307_v2, %v211_v1  ;;  %vm319_vm9 = vcmp.gt.f32.partialorder %v313_v0, 0.0  ;;  %v324_v12 = vsel %vm316_vm12, %v298_v3, %v320_v9 }
 0x1af   :  { %v322_v7 = vmul.f32 0.01, %v308_v5  ;;  %v327_v8 = vsel %vm319_vm9, %v313_v0, %v323_v4  ;;  %vm318_vm10 = vcmp.gt.f32.partialorder %v308_v5, 0.0 }
 0x1b0   :  { %480 = vmatprep.subr.mxu0 %v327_v8 }
 0x1b1   :  { %481 = vmatpush3.msra.mxu0 %v327_v8  ;;  %v326_v10 = vsel %vm318_vm10, %v308_v5, %v322_v7 }
 0x1b2   :  { %482 = vmatprep.subr.mxu0 %v326_v10 }
 0x1b3   :  { %483 = vmatpush3.msra.mxu0 %v326_v10 }
 0x1b4   :  { %484 = vmatprep.subr.mxu0 %v325_v11 }
 0x1b5   :  { %485 = vmatpush3.msra.mxu0 %v325_v11 }
 0x1b6   :  { %486 = vmatprep.subr.mxu0 %v324_v12 }
 0x1b7   :  { %487 = vmatpush3.msra.mxu0 %v324_v12 }
 0x1b8   :  { %489 = vmatmul.mubr.msk.f32.vlgmr.msra.gmra.mxu0 %vm342_vm8, %v329_v13 }
 0x278   :  { %v490_v15 = vpop.f32.mrf.mxu0 }
 0x279   :  { %v421_v16 = vadd.f32 %v490_v15, %v340_v14 }
 0x27a   :  { %v415_v18 = vpop.f32.mrf.mxu0 }
 0x27b   :  { %vm425_vm13 = vcmp.gt.f32.partialorder %v421_v16, 0.0  ;;  %v427_v19 = vmul.f32 0.01, %v421_v16  ;;  %v416_v20 = vadd.f32 %v415_v18, %v335_v17 }
 0x27d   :  { %v429_v21 = vsel %vm425_vm13, %v421_v16, %v427_v19  ;;  %vm424_vm15 = vcmp.gt.f32.partialorder %v416_v20, 0.0  ;;  %v426_v22 = vmul.f32 0.01, %v416_v20 }
 0x27e   :  { %433 = vst.msk [vmem:[%s630_s6 + $0x8] sm:$0x1f] %vm432_vm14, %v429_v21 }
 0x27f   :  { %v428_v23 = vsel %vm424_vm15, %v416_v20, %v426_v22 }
 0x280   :  { %431 = vst.msk [vmem:[%s630_s6] sm:$0xff] %vm430_vm0, %v428_v23 }

</bundles_post_ra>
